<compile_context>
chip_gen: v5e
topology: v5e:2x2
jax: 0.10.0
libtpu: 0.0.40
codegen_flags: <defaults>
</compile_context>

<pallas_src>
import jax
import jax.numpy as jnp
from jax.experimental import pallas as pl
from jax.experimental.pallas import tpu as pltpu

_LANES = 128
_SUBLANES = 8


def _star_relu_kernel(sb_smem, x_ref, o_ref):
    # sb_smem: (2,) SMEM  [scale, bias];  x_ref/o_ref: (block_rows, 128) VMEM.
    s = sb_smem[0]
    b = sb_smem[1]
    x = x_ref[...]                       # single full-block load
    r = jnp.maximum(x, 0.0)              # VPU
    o_ref[...] = s * (r * r) + b         # single full-block, lane-dense store


def star_relu(x, scale, bias, *, max_block_rows=512):
    """StarReLU forward: scale * relu(x)**2 + bias, elementwise over x."""
    orig_shape = x.shape
    orig_dtype = x.dtype

    xf = x.reshape(-1).astype(jnp.float32)
    n = xf.shape[0]

    # Lane-dense 2-D view: (rows, 128), rows rounded up to a sublane multiple.
    rows = -(-n // _LANES)
    rows = -(-rows // _SUBLANES) * _SUBLANES

    # Block rows: multiple of 8, capped, and split so the grid has >= 2 steps
    # when possible (keeps both v7x TensorCores busy; free elsewhere).
    block_rows = min(rows, max_block_rows)
    if rows // block_rows < 2 and rows >= 2 * _SUBLANES:
        block_rows = max(_SUBLANES, (rows // 2 // _SUBLANES) * _SUBLANES)

    total_rows = -(-rows // block_rows) * block_rows
    pad = total_rows * _LANES - n
    if pad:
        xf = jnp.pad(xf, (0, pad))
    x2 = xf.reshape(total_rows, _LANES)

    sb = jnp.stack(
        [jnp.asarray(scale, jnp.float32).reshape(()),
         jnp.asarray(bias, jnp.float32).reshape(())]
    )  # flat (2,) -> tiny 1-D SMEM allocation

    grid = (total_rows // block_rows,)
    out2 = pl.pallas_call(
        _star_relu_kernel,
        out_shape=jax.ShapeDtypeStruct((total_rows, _LANES), jnp.float32),
        grid_spec=pltpu.PrefetchScalarGridSpec(
            num_scalar_prefetch=0,
            grid=grid,
            in_specs=[
                pl.BlockSpec(memory_space=pltpu.MemorySpace.SMEM),        # [scale, bias]
                pl.BlockSpec((block_rows, _LANES), lambda i: (i, 0)),     # x slab
            ],
            out_specs=pl.BlockSpec((block_rows, _LANES), lambda i: (i, 0)),
        ),
        compiler_params=pltpu.CompilerParams(
            dimension_semantics=("parallel",),
        ),
    )(sb, x2)

    out = out2.reshape(-1)[:n].reshape(orig_shape)
    return out.astype(orig_dtype)


def reference_forward(x, scale, bias):
    x = x.astype(jnp.float32)
    r = jnp.maximum(x, 0.0)
    return scale.reshape(()) * r * r + bias.reshape(())


if __name__ == "__main__":
    B, C, H, W = 2, 4, 16, 16

    key = jax.random.PRNGKey(0)
    kx, ks, kb = jax.random.split(key, 3)
    x = jax.random.normal(kx, (B, C, H, W), dtype=jnp.float32)

    # nn.Parameter(scale_value * ones(1)) / nn.Parameter(bias_value * ones(1));
    # defaults are 1.0 / 0.0 — use non-trivial deterministic values so both
    # parameters are numerically exercised.
    scale = 1.0 + 0.5 * jax.random.normal(ks, (1,), dtype=jnp.float32)
    bias = 0.1 * jax.random.normal(kb, (1,), dtype=jnp.float32)

    out = star_relu(x, scale, bias)
    out = jax.block_until_ready(out)

    ref = reference_forward(x, scale, bias)
    ref = jax.block_until_ready(ref)

    err = float(jnp.max(jnp.abs(out - ref)))
    assert err < 1e-6, f"max abs err {err}"
    print("KERNEL_OK")
</pallas_src>

<mosaic_0001>
module attributes {stable_mosaic.version = 11 : i64} {
  func.func @_star_relu_kernel(%arg0: i32, %arg1: memref<2xf32, #tpu.memory_space<smem>>, %arg2: memref<8x128xf32, #tpu.memory_space<vmem>>, %arg3: memref<8x128xf32, #tpu.memory_space<vmem>>) attributes {dimension_semantics = [#tpu.dimension_semantics<parallel>], iteration_bounds = array<i64: 2>, scalar_prefetch = 0 : i64, scratch_operands = 0 : i64, tpu.core_type = #tpu.core_type<tc>, window_params = [{transform_indices = @transform_0, window_bounds = array<i64: 2>}, {transform_indices = @transform_1, window_bounds = array<i64: 8, 128>}, {transform_indices = @transform_2, window_bounds = array<i64: 8, 128>}]} {
    %c0 = arith.constant 0 : index
    %0 = memref.load %arg1[%c0] : memref<2xf32, #tpu.memory_space<smem>>
    %c1 = arith.constant 1 : index
    %1 = memref.load %arg1[%c1] : memref<2xf32, #tpu.memory_space<smem>>
    %c0_0 = arith.constant 0 : index
    %c0_1 = arith.constant 0 : index
    %2 = vector.load %arg2[%c0_0, %c0_1] : memref<8x128xf32, #tpu.memory_space<vmem>>, vector<8x128xf32>
    %cst = arith.constant 0.000000e+00 : f32
    %3 = vector.broadcast %cst : f32 to vector<8x128xf32>
    %4 = arith.maximumf %2, %3 : vector<8x128xf32>
    %5 = arith.mulf %4, %4 : vector<8x128xf32>
    %6 = vector.broadcast %0 : f32 to vector<8x128xf32>
    %7 = arith.mulf %6, %5 : vector<8x128xf32>
    %8 = vector.broadcast %1 : f32 to vector<8x128xf32>
    %9 = arith.addf %7, %8 : vector<8x128xf32>
    %c0_2 = arith.constant 0 : index
    %c0_3 = arith.constant 0 : index
    %10 = vector.load %arg3[%c0_2, %c0_3] : memref<8x128xf32, #tpu.memory_space<vmem>>, vector<8x128xf32>
    tpu.vector_store %arg3[%c0_2, %c0_3], %9 {strides = array<i32>} : memref<8x128xf32, #tpu.memory_space<vmem>>, vector<8x128xf32>,
    return
  }
  func.func @transform_0(%arg0: i32) -> i32 {
    %c0_i32 = arith.constant 0 : i32
    %c0_i32_0 = arith.constant 0 : i32
    return %c0_i32 : i32
  }
  func.func @transform_1(%arg0: i32) -> (i32, i32) {
    %c0_i32 = arith.constant 0 : i32
    %c0_i32_0 = arith.constant 0 : i32
    return %arg0, %c0_i32 : i32, i32
  }
  func.func @transform_2(%arg0: i32) -> (i32, i32) {
    %c0_i32 = arith.constant 0 : i32
    %c0_i32_0 = arith.constant 0 : i32
    return %arg0, %c0_i32 : i32, i32
  }
}

</mosaic_0001>

<bundles_post_ra>
// kernel: tpu_custom_call.1
= control target key start
LH: loop header
LB: loop body
LE: loop exit
PB: predicated region body
PF: predicated region fallthrough
CT: control target
= control target key end

     0   :  { %7 = vsyncpa [#allocation5], 0  ;;  %s626_s0 = inlined_call_operand.hbm [shape: f32[2], index: 0, kind: input, shape index: {}]   ;;  %s627_s1 = inlined_call_operand.hbm [shape: f32[16,128], index: 1, kind: input, shape index: {}]   ;;  %s628_s2 = inlined_call_operand.hbm [shape: f32[16,128], index: 2, kind: output, shape index: {}]  }
   0x1   :  { %8 = vsyncpa [#allocation3], 0 }
   0x2   :  { %10 = vsyncpa [#allocation3 + $0x1], 0 }
   0x3   :  { %11 = vsyncpa [#allocation4], 0 }
   0x4   :  { %13 = vsyncpa [#allocation4 + $0x1], 0  ;;  %s488_s9 = smov 0   ;;  %s490_s10 = smov 0  }
   0x5   :  { %s492_s11 = smov 0   ;;  %s494_s12 = smov 0  }
   0x6 LB: > { %s509_s13 = sadd.s32 4294967295, %s470_s12   ;;  %s283_s14 = sadd.s32 4294967294, %s470_s12   ;;  %s470_s12 = sphi %s494_s12, %s638_s12   ;;  %s466_s11 = sphi %s492_s11, %s637_s11   ;;  %s462_s10 = sphi %s490_s10, %s636_s10   ;;  %s458_s9 = sphi %s488_s9, %s635_s9  }
   0x7   : > { %p60_p0 = scmp.ne.s32.totalorder %s462_s10, %s458_s9  ;;  %p61_p1 = scmp.eq.s32.totalorder %s509_s13, 0 }
   0x8   : > { %p84_p2 = scmp.eq.s32.totalorder %s509_s13, 1  ;;  %p90_p3 = scmp.eq.s32.totalorder %s283_s14, 1 }
   0x9   : > { %p518_p4 = por %p61_p1, %p60_p0  ;;  %p284_p5 = scmp.ge.s32.totalorder %s470_s12, 1 }
   0xa   : > { %p523_p6 = por %p90_p3, %p60_p0  ;;  %p97_p7 = scmp.lt.s32.totalorder %s470_s12, 3 }
   0xb   : > { %s109_s19 = sshll.u32 %s626_s0, 4  ;;  %s539_s21 = sadd.s32 1, %s470_s12   ;;  %s110_s19 = int_to_ptr.hbm [resolvable:$true] %s109_s19 }
   0xc   : > { %p531_p8 = pnand %p284_p5, %p97_p7  ;;  %s44_s22 = ssub.s32 %s470_s12, %s539_s21 }
   0xd   : > { %p45_p12 = scmp.eq.s32.totalorder %s44_s22, 0  ;;  %s47_s23 = sadd.s32 1, %s466_s11 }
   0xe   : > { %p306_p10 = pneg %p531_p8  ;;  %p54_p13 = scmp.ne.s32.totalorder %s466_s11, %s462_s10 }
   0xf   : > { %s472_s24 = smov [#allocation2]   ;;  %p55_p0 = scmp.eq.s32.totalorder %s470_s12, 0 }
  0x10   : > { %p307_p11 = pnand %p306_p10, %p61_p1  ;;  %p554_p3 = por %p84_p2, %p54_p13 }
  0x11   : > { %s549_s25 = scalar_select %p45_p12, %s466_s11, %s47_s23  }
  0x12   : > { %309 = dma.hbm_to_smem (!%p307_p11), %s110_s19, 16, %s472_s24, [#allocation5]  }
  0x13   : > { %s120_s27 = sand.u32 1, %s466_s11   ;;  %p56_p5 = por %p55_p0, %p54_p13 }
  0x14   : > { %p319_p7 = scmp.lt.s32.totalorder %s470_s12, 2  ;;  %s287_s28 = sshll.u32 %s120_s27, 3 }
  0x15   : > { %s288_s29 = sshll.u32 %s470_s12, 3  ;;  %s124_s6 = scalar_lea.vmem [#allocation6], %s287_s28 }
  0x16   : > { %s128_s4 = scalar_lea.hbm %s627_s1, %s288_s29  ;;  %s132_s7 = sshll.u32 %s124_s6, 4  ;;  %s133_s7 = int_to_ptr.vmem [resolvable:$true] %s132_s7 }
  0x17   : > { %s130_s5 = sshll.u32 %s128_s4, 4  ;;  %p564_p10 = pnand %p319_p7, %p56_p5  ;;  %s131_s5 = int_to_ptr.hbm [resolvable:$true] %s130_s5 }
  0x18   : > { %s121_s14 = scalar_lea.sflag [#allocation3], %s120_s27  ;;  %s370_s17 = sshra.s32 %s131_s5, 4  ;;  %s371_s17 = int_to_ptr.hbm [resolvable:$true] %s370_s17 }
  0x19   : > { %s372_s18 = scalar_lea.hbm %s371_s17, 8  ;;  %p374_p11 = pneg %p564_p10 }
  0x1a   : > { %p373_p2 = scmp.ne.s32.totalorder %s371_s17, %s372_s18  ;;  %s377_s23 = scalar_lea.hbm %s627_s1, 16 }
  0x1b   : > { %p378_p0 = scmp.lt.s32.totalorder %s371_s17, %s627_s1  ;;  %p379_p5 = scmp.lt.s32.totalorder %s377_s23, %s372_s18 }
  0x1c   : > { %p375_p12 = pnand %p374_p11, %p373_p2 }
  0x1d   : > { %p380_p7 = por %p379_p5, %p378_p0 }
  0x1e   : > { %p376_p13 = pneg %p375_p12 }
  0x20   : > { %p381_p9 = pnand %p380_p7, %p376_p13 }
  0x22   : > { %384 = shalt.err (!%p381_p9)
}
  0x23   : > { %313 = dma.hbm_to_vmem [thread:$0]  (!%p564_p10), %s131_s5, 128, %s133_s7, %s121_s14  }
  0x24   : > { %141 = sbr.rel (%p531_p8) target bundleno = 64 (0x40), region = 28 }
  0x29   : > { %445 = dma.done.wait (%p61_p1), [#allocation5], 16  }
  0x2a   : > { %447 = vsyncadd (%p61_p1), [#allocation5], 4294967280  ;;  %s585_s27 = sand.u32 1, %s462_s10  }
  0x2b   : > { %s291_s29 = sshll.u32 %s585_s27, 3  ;;  %s149_s30 = scalar_lea.sflag [#allocation3], %s585_s27 }
  0x2c   : > { %s152_s3 = scalar_lea.vmem [#allocation6], %s291_s29 }
  0x2d   : > { %449 = dma.done.wait (%p518_p4), %s149_s30, 128  }
  0x2e   : > { %451 = vsyncadd (%p518_p4), %s149_s30, 4294967168 }
  0x2f   : > { %158 = sfence }
  0x30   : > { %s175_s20 = sld [smem:[#allocation2]]  ;;  %v177_v0 = vld [vmem:[%s152_s3] sm:$0xff]  ;;  %s295_s5 = sshll.u32 %s509_s13, 3 }
  0x31   : > { %s293_s4 = sld [smem:[#allocation2 + $0x1]]  ;;  %v178_v1 = vmax.f32 %v177_v0, 0.0  ;;  %s196_s8 = scalar_lea.hbm %s628_s2, %s295_s5 }
  0x32   : > { %s174_s14 = scalar_lea.vmem [#allocation7], %s291_s29  ;;  %s200_s18 = sshll.u32 %s196_s8, 4  ;;  %s201_s18 = int_to_ptr.hbm [resolvable:$true] %s200_s18 }
  0x33   : > { %v179_v2 = vmul.f32 %v178_v1, %v178_v1  ;;  %s198_s17 = sshll.u32 %s174_s14, 4  ;;  %s186_s15 = scalar_lea.sflag [#allocation4], %s585_s27  ;;  %s199_s17 = int_to_ptr.vmem [resolvable:$true] %s198_s17 }
  0x34   : > { %s414_s19 = sshra.s32 %s201_s18, 4  ;;  %s420_s24 = scalar_lea.hbm %s628_s2, 16  ;;  %s415_s19 = int_to_ptr.hbm [resolvable:$true] %s414_s19 }
  0x35   : > { %s416_s22 = scalar_lea.hbm %s415_s19, 8  ;;  %p421_p9 = scmp.lt.s32.totalorder %s415_s19, %s628_s2 }
  0x36   : > { %v180_v3 = vstv %s175_s20  ;;  %p417_p1 = scmp.ne.s32.totalorder %s415_s19, %s416_s22  ;;  %p422_p10 = scmp.lt.s32.totalorder %s420_s24, %s416_s22 }
  0x37   : > { %v181_v4 = vmul.f32 %v180_v3, %v179_v2  ;;  %v182_v5 = vstv %s293_s4 }
  0x38   : > { %p418_p4 = pnand %p417_p1, %p554_p3  ;;  %p423_p2 = por %p422_p10, %p421_p9 }
  0x39   : > { %v183_v6 = vadd.f32 %v182_v5, %v181_v4 }
  0x3a   : > { %p419_p8 = pneg %p418_p4 }
  0x3b   : > { %184 = vst [vmem:[%s174_s14] sm:$0xff] %v183_v6 }
  0x3c   : > { %p424_p11 = pnand %p423_p2, %p419_p8 }
  0x3e   : > { %427 = shalt.err (!%p424_p11)
}
  0x3f   : > { %304 = dma.vmem_to_hbm [thread:$0]  (%p554_p3), %s199_s17, 128, %s201_s18, %s186_s15  }
  0x40 PF: > { %s212_s27 = sand.u32 1, %s458_s9   ;;  %p634_p12 = scmp.ge.s32.totalorder %s470_s12, 2 }
  0x41   : > { %s213_s30 = scalar_lea.sflag [#allocation4], %s212_s27 }
  0x42   : > { %p315_p13 = pnand %p634_p12, %p523_p6 }
  0x44   : > { %p316_p0 = pneg %p315_p13 }
  0x46   : > { %453 = dma.done.wait (%p316_p0), %s213_s30, 128  }
  0x47   : > { %455 = vsyncadd (%p316_p0), %s213_s30, 4294967168  ;;  %p16_p5 = scmp.ge.s32.totalorder %s539_s21, 4   ;;  %s635_s9 = smov %s462_s10 }
  0x48   : > { %s636_s10 = smov %s466_s11  ;;  %s637_s11 = smov %s549_s25 }
  0x49   : > { %s638_s12 = smov %s539_s21  ;;  %18 = sbr.rel (!%p16_p5) target bundleno = 6 (0x6), region = 78 }
  0x4e   :  { %219 = vsyncpa [#allocation3], 1 }
  0x4f   :  { %221 = vsyncpa [#allocation3 + $0x1], 1 }
  0x50   :  { %222 = vsyncpa [#allocation4], 1 }
  0x51   :  { %224 = vsyncpa [#allocation4 + $0x1], 1 }
  0x52   :  { %225 = vsyncpa [#allocation5], 1 }
  0x53   :  { %227 = vsyncpa [#allocation5 + $0x1], 1 }

</bundles_post_ra>
